<compile_context>
chip_gen: v7x
topology: tpu7x:2x2x1
jax: 0.10.0
libtpu: 0.0.40
codegen_flags: <defaults>
</compile_context>

<pallas_src>
import numpy as np
import jax
import jax.numpy as jnp
from jax.experimental import pallas as pl
from jax.experimental.pallas import tpu as pltpu

T_SAMPLES = 81          # matches torch.linspace(0, 1, 81)
S_PAD = 88              # samples padded to a sublane multiple (8)
LANE = 128              # points per chunk (lane axis)

# t samples padded with 1.0: padded rows evaluate to the curve endpoint, which
# already appears at row 80, so they can never change the per-point min.
_T_NP = np.concatenate(
    [np.linspace(0.0, 1.0, T_SAMPLES), np.ones((S_PAD - T_SAMPLES,))]
).astype(np.float32)


def _bezier_kernel(curve_ref, pts_ref, out_ref):
    # curve_ref: (2, S_PAD, LANE) VMEM -- bezier_x / bezier_y, pre-broadcast on lanes
    # pts_ref  : (1, 2, LANE)     VMEM -- one chunk of points, lane-dense
    # out_ref  : (1, 1, LANE)     VMEM -- per-lane min distance for this chunk
    bx = curve_ref[0]                       # (S_PAD, LANE)
    by = curve_ref[1]
    p = pts_ref[0]                          # (2, LANE)
    px = p[0:1, :]                          # (1, LANE) -> sublane-broadcast
    py = p[1:2, :]

    dx = bx - px                            # (S_PAD, LANE)  VPU
    dy = by - py
    d2 = dx * dx + dy * dy

    # min over the curve-sample (sublane) axis: VPU vreg-mins + one 8-wide
    # sublane reduce; sqrt after the min (monotone => exact), EUP on one vreg.
    out_ref[0] = jnp.sqrt(jnp.min(d2, axis=0, keepdims=True))   # (1, LANE)


@jax.jit
def cubic_bezier_loss(ps, ctps):
    """ps: (N, 2) curve points, ctps: (4,) = [x1, y1, x2, y2] control params."""
    ps = jnp.asarray(ps, jnp.float32)
    ctps = jnp.asarray(ctps, jnp.float32)

    x0, y0 = ps[0, 0], ps[0, 1]
    x3, y3 = ps[-1, 0], ps[-1, 1]
    x1, y1, x2, y2 = ctps[0], ctps[1], ctps[2], ctps[3]

    # Curve evaluation in the wrapper (88 samples x 2 -> negligible XLA work),
    # same De Casteljau nesting as the PyTorch forward.  At t=0 (omt=1) this
    # yields exactly (x0, y0) in f32, which the padded-point-lane trick relies on.
    t = jnp.asarray(_T_NP)
    omt = 1.0 - t
    bx = omt * (omt * (omt * x0 + t * x1) + t * (omt * x1 + t * x2)) \
       + t * (omt * (omt * x1 + t * x2) + t * (omt * x2 + t * x3))
    by = omt * (omt * (omt * y0 + t * y1) + t * (omt * y1 + t * y2)) \
       + t * (omt * (omt * y1 + t * y2) + t * (omt * y2 + t * y3))
    curve = jnp.broadcast_to(jnp.stack([bx, by])[:, :, None], (2, S_PAD, LANE))

    # Inner points, lane-dense in 128-wide chunks.  Padded lanes hold ps[0]:
    # its squared distance to the t=0 sample is exactly 0, so padded lanes
    # contribute exactly 0 to the loss (no mask needed).
    n_valid = ps.shape[0] - 2
    num_chunks = max(1, -(-n_valid // LANE))
    n_pad = num_chunks * LANE
    inner = ps[1:-1]                                          # (n_valid, 2)
    if n_pad > n_valid:
        pad = jnp.broadcast_to(ps[0:1, :], (n_pad - n_valid, 2))
        pts2 = jnp.concatenate([inner, pad], axis=0)
    else:
        pts2 = inner
    pts = jnp.stack(
        [pts2[:, 0].reshape(num_chunks, LANE),
         pts2[:, 1].reshape(num_chunks, LANE)], axis=1)       # (chunks, 2, LANE)

    out = pl.pallas_call(
        _bezier_kernel,
        out_shape=jax.ShapeDtypeStruct((num_chunks, 1, LANE), jnp.float32),
        grid=(num_chunks,),
        in_specs=[
            # curve block index is constant across the grid -> DMA'd once.
            pl.BlockSpec((2, S_PAD, LANE), lambda i: (0, 0, 0)),
            pl.BlockSpec((1, 2, LANE), lambda i: (i, 0, 0)),
        ],
        out_specs=pl.BlockSpec((1, 1, LANE), lambda i: (i, 0, 0)),
        compiler_params=pltpu.CompilerParams(
            dimension_semantics=("parallel",)),
    )(curve, pts)

    # Per-chunk lane-dense partial results; single tiny reduction in XLA.
    return jnp.sum(out)


def _reference_loss(ps, ctps):
    """Pure-JAX reference mirroring the PyTorch forward (float32)."""
    ps = jnp.asarray(ps, jnp.float32)
    ctps = jnp.asarray(ctps, jnp.float32)
    x0, y0 = ps[0, 0], ps[0, 1]
    x3, y3 = ps[-1, 0], ps[-1, 1]
    x1, y1, x2, y2 = ctps[0], ctps[1], ctps[2], ctps[3]
    t = jnp.linspace(0.0, 1.0, T_SAMPLES, dtype=jnp.float32)
    omt = 1.0 - t
    bx = omt * (omt * (omt * x0 + t * x1) + t * (omt * x1 + t * x2)) \
       + t * (omt * (omt * x1 + t * x2) + t * (omt * x2 + t * x3))
    by = omt * (omt * (omt * y0 + t * y1) + t * (omt * y1 + t * y2)) \
       + t * (omt * (omt * y1 + t * y2) + t * (omt * y2 + t * y3))
    bezier = jnp.stack((bx, by), axis=1)                  # (81, 2)
    inner = ps[1:-1]                                      # (N-2, 2)
    diffs = bezier[None, :, :] - inner[:, None, :]        # (N-2, 81, 2)
    dists = jnp.sqrt(jnp.sum(diffs ** 2, axis=2))         # (N-2, 81)
    return jnp.sum(jnp.min(dists, axis=1))


if __name__ == "__main__":
    key = jax.random.PRNGKey(0)
    k_ps, k_ct = jax.random.split(key)

    # Small deterministic inputs consistent with the module's __init__:
    # ps: (N, 2) curve points, ctps: (4,) control params.
    ps = jax.random.uniform(k_ps, (10, 2), dtype=jnp.float32) * 10.0
    ctps = jax.random.uniform(k_ct, (4,), dtype=jnp.float32) * 10.0

    loss = jax.block_until_ready(cubic_bezier_loss(ps, ctps))
    ref = jax.block_until_ready(_reference_loss(ps, ctps))

    np.testing.assert_allclose(np.asarray(loss), np.asarray(ref),
                               rtol=1e-4, atol=1e-4)
    print("KERNEL_OK")
</pallas_src>

<mosaic_0001>
module attributes {stable_mosaic.version = 11 : i64} {
  func.func @_bezier_kernel(%arg0: i32, %arg1: memref<2x88x128xf32, #tpu.memory_space<vmem>>, %arg2: memref<1x2x128xf32, #tpu.memory_space<vmem>>, %arg3: memref<1x1x128xf32, #tpu.memory_space<vmem>>) attributes {dimension_semantics = [#tpu.dimension_semantics<parallel>], iteration_bounds = array<i64: 1>, scalar_prefetch = 0 : i64, scratch_operands = 0 : i64, tpu.core_type = #tpu.core_type<tc>, window_params = [{pipeline_mode = #tpu.pipeline_mode<synchronous>, transform_indices = @transform_0, window_bounds = array<i64: 2, 88, 128>}, {transform_indices = @transform_1, window_bounds = array<i64: 1, 2, 128>}, {transform_indices = @transform_2, window_bounds = array<i64: 1, 1, 128>}]} {
    %c0 = arith.constant 0 : index
    %c0_0 = arith.constant 0 : index
    %c0_1 = arith.constant 0 : index
    %0 = vector.load %arg1[%c0, %c0_0, %c0_1] : memref<2x88x128xf32, #tpu.memory_space<vmem>>, vector<1x88x128xf32>
    %1 = vector.shape_cast %0 : vector<1x88x128xf32> to vector<88x128xf32>
    %c1 = arith.constant 1 : index
    %c0_2 = arith.constant 0 : index
    %c0_3 = arith.constant 0 : index
    %2 = vector.load %arg1[%c1, %c0_2, %c0_3] : memref<2x88x128xf32, #tpu.memory_space<vmem>>, vector<1x88x128xf32>
    %3 = vector.shape_cast %2 : vector<1x88x128xf32> to vector<88x128xf32>
    %c0_4 = arith.constant 0 : index
    %c0_5 = arith.constant 0 : index
    %c0_6 = arith.constant 0 : index
    %4 = vector.load %arg2[%c0_4, %c0_5, %c0_6] : memref<1x2x128xf32, #tpu.memory_space<vmem>>, vector<1x2x128xf32>
    %5 = vector.shape_cast %4 : vector<1x2x128xf32> to vector<2x128xf32>
    %6 = vector.extract_strided_slice %5 {offsets = [0, 0], sizes = [1, 128], strides = [1, 1]} : vector<2x128xf32> to vector<1x128xf32>
    %7 = vector.extract_strided_slice %5 {offsets = [1, 0], sizes = [1, 128], strides = [1, 1]} : vector<2x128xf32> to vector<1x128xf32>
    %8 = vector.broadcast %6 : vector<1x128xf32> to vector<88x128xf32>
    %9 = arith.subf %1, %8 : vector<88x128xf32>
    %10 = vector.broadcast %7 : vector<1x128xf32> to vector<88x128xf32>
    %11 = arith.subf %3, %10 : vector<88x128xf32>
    %12 = arith.mulf %9, %9 : vector<88x128xf32>
    %13 = arith.mulf %11, %11 : vector<88x128xf32>
    %14 = arith.addf %12, %13 : vector<88x128xf32>
    %cst = arith.constant dense<0x7F800000> : vector<128xf32>
    %15 = vector.multi_reduction <minimumf>, %14, %cst [0] : vector<88x128xf32> to vector<128xf32>
    %16 = vector.shape_cast %15 : vector<128xf32> to vector<1x128xf32>
    %17 = math.sqrt %16 : vector<1x128xf32>
    %c0_7 = arith.constant 0 : index
    %c0_8 = arith.constant 0 : index
    %c0_9 = arith.constant 0 : index
    %18 = vector.load %arg3[%c0_7, %c0_8, %c0_9] : memref<1x1x128xf32, #tpu.memory_space<vmem>>, vector<1x1x128xf32>
    %19 = vector.shape_cast %18 : vector<1x1x128xf32> to vector<1x128xf32>
    %20 = vector.shape_cast %17 : vector<1x128xf32> to vector<1x1x128xf32>
    tpu.vector_store %arg3[%c0_7, %c0_8, %c0_9], %20 {strides = array<i32>} : memref<1x1x128xf32, #tpu.memory_space<vmem>>, vector<1x1x128xf32>,
    return
  }
  func.func @transform_0(%arg0: i32) -> (i32, i32, i32) {
    %c0_i32 = arith.constant 0 : i32
    %c0_i32_0 = arith.constant 0 : i32
    %c0_i32_1 = arith.constant 0 : i32
    %c0_i32_2 = arith.constant 0 : i32
    return %c0_i32, %c0_i32_0, %c0_i32_1 : i32, i32, i32
  }
  func.func @transform_1(%arg0: i32) -> (i32, i32, i32) {
    %c0_i32 = arith.constant 0 : i32
    %c0_i32_0 = arith.constant 0 : i32
    %c0_i32_1 = arith.constant 0 : i32
    return %arg0, %c0_i32, %c0_i32_0 : i32, i32, i32
  }
  func.func @transform_2(%arg0: i32) -> (i32, i32, i32) {
    %c0_i32 = arith.constant 0 : i32
    %c0_i32_0 = arith.constant 0 : i32
    %c0_i32_1 = arith.constant 0 : i32
    return %arg0, %c0_i32, %c0_i32_0 : i32, i32, i32
  }
}

</mosaic_0001>

<bundles_post_ra>
// kernel: cubic_bezier_loss.1
= control target key start
LH: loop header
LB: loop body
LE: loop exit
PB: predicated region body
PF: predicated region fallthrough
CT: control target
= control target key end

     0   :  { %v35_v0 = vlaneseq  ;;  %s226_s0 = inlined_call_operand.vmem [shape: f32[2,88,128], index: 0, kind: input, shape index: {}]   ;;  %s227_s1 = inlined_call_operand.vmem [shape: f32[1,2,128], index: 1, kind: input, shape index: {}]   ;;  %s228_s2 = inlined_call_operand.vmem [shape: f32[1,1,128], index: 2, kind: output, shape index: {}]  }
   0x1   :  { %v11_v4 = vld [vmem:[%s226_s0] sm:$0xff]  ;;  %v12_v5 = vld [vmem:[%s226_s0 + $0x8] sm:$0xff]  ;;  %v13_v6 = vld [vmem:[%s226_s0 + $0x10] sm:$0xff] }
   0x2   :  { %v36_v1 = vshrl.u32 %v35_v0, 7  ;;  %v14_v7 = vld [vmem:[%s226_s0 + $0x18] sm:$0xff]  ;;  %v15_v8 = vld [vmem:[%s226_s0 + $0x20] sm:$0xff]  ;;  %v16_v9 = vld [vmem:[%s226_s0 + $0x28] sm:$0xff] }
   0x3   :  { %v17_v10 = vld [vmem:[%s226_s0 + $0x30] sm:$0xff]  ;;  %v18_v11 = vld [vmem:[%s226_s0 + $0x38] sm:$0xff]  ;;  %v34_v12 = vld [vmem:[%s227_s1] sm:$0x3] }
   0x4   :  { %v37_v2 = vsub.s32 0, %v36_v1  ;;  %v52_v3 = vsub.s32 1, %v36_v1  ;;  %v19_v13 = vld [vmem:[%s226_s0 + $0x40] sm:$0xff]  ;;  %v20_v14 = vld [vmem:[%s226_s0 + $0x48] sm:$0xff]  ;;  %v21_v15 = vld [vmem:[%s226_s0 + $0x50] sm:$0xff] }
   0x5   :  { %v126_v18 = vld [vmem:[%s226_s0 + $0x58] sm:$0xff]  ;;  %v127_v19 = vld [vmem:[%s226_s0 + $0x60] sm:$0xff]  ;;  %v128_v20 = vld [vmem:[%s226_s0 + $0x68] sm:$0xff] }
   0x6   :  { %v38_v16 = vrot.slane %v34_v12, %v37_v2  ;;  %v53_v17 = vrot.slane %v34_v12, %v52_v3  ;;  %v129_v21 = vld [vmem:[%s226_s0 + $0x70] sm:$0xff]  ;;  %v130_v22 = vld [vmem:[%s226_s0 + $0x78] sm:$0xff]  ;;  %v131_v23 = vld [vmem:[%s226_s0 + $0x80] sm:$0xff] }
   0x7   :  { %v132_v28 = vld [vmem:[%s226_s0 + $0x88] sm:$0xff]  ;;  %v133_v29 = vld [vmem:[%s226_s0 + $0x90] sm:$0xff]  ;;  %v134_v30 = vld [vmem:[%s226_s0 + $0x98] sm:$0xff] }
   0x8   :  { %v39_v24 = vsub.f32 %v11_v4, %v38_v16  ;;  %v40_v25 = vsub.f32 %v12_v5, %v38_v16  ;;  %v41_v26 = vsub.f32 %v13_v6, %v38_v16  ;;  %v42_v27 = vsub.f32 %v14_v7, %v38_v16  ;;  %v135_v35 = vld [vmem:[%s226_s0 + $0xa0] sm:$0xff]  ;;  %v136_v36 = vld [vmem:[%s226_s0 + $0xa8] sm:$0xff] }
   0x9   :  { %v43_v31 = vsub.f32 %v15_v8, %v38_v16  ;;  %v44_v32 = vsub.f32 %v16_v9, %v38_v16  ;;  %v45_v33 = vsub.f32 %v17_v10, %v38_v16  ;;  %v46_v34 = vsub.f32 %v18_v11, %v38_v16 }
   0xa   :  { %v47_v37 = vsub.f32 %v19_v13, %v38_v16  ;;  %v48_v38 = vsub.f32 %v20_v14, %v38_v16  ;;  %v49_v39 = vsub.f32 %v21_v15, %v38_v16  ;;  %v54_v40 = vsub.f32 %v126_v18, %v53_v17 }
   0xb   :  { %v55_v41 = vsub.f32 %v127_v19, %v53_v17  ;;  %v56_v42 = vsub.f32 %v128_v20, %v53_v17  ;;  %v57_v43 = vsub.f32 %v129_v21, %v53_v17  ;;  %v58_v44 = vsub.f32 %v130_v22, %v53_v17 }
   0xc   :  { %v59_v45 = vsub.f32 %v131_v23, %v53_v17  ;;  %v60_v46 = vsub.f32 %v132_v28, %v53_v17  ;;  %v61_v47 = vsub.f32 %v133_v29, %v53_v17  ;;  %v62_v48 = vsub.f32 %v134_v30, %v53_v17 }
   0xd   :  { %v63_v49 = vsub.f32 %v135_v35, %v53_v17  ;;  %v64_v50 = vsub.f32 %v136_v36, %v53_v17  ;;  %v65_v51 = vmul.f32 %v39_v24, %v39_v24  ;;  %v66_v52 = vmul.f32 %v40_v25, %v40_v25 }
   0xe   :  { %v67_v53 = vmul.f32 %v41_v26, %v41_v26  ;;  %v68_v54 = vmul.f32 %v42_v27, %v42_v27  ;;  %v69_v55 = vmul.f32 %v43_v31, %v43_v31  ;;  %v70_v56 = vmul.f32 %v44_v32, %v44_v32 }
   0xf   :  { %v71_v57 = vmul.f32 %v45_v33, %v45_v33  ;;  %v72_v58 = vmul.f32 %v46_v34, %v46_v34  ;;  %v73_v59 = vmul.f32 %v47_v37, %v47_v37  ;;  %v74_v60 = vmul.f32 %v48_v38, %v48_v38 }
  0x10   :  { %v75_v61 = vmul.f32 %v49_v39, %v49_v39  ;;  %v76_v62 = vmul.f32 %v54_v40, %v54_v40  ;;  %v77_v63 = vmul.f32 %v55_v41, %v55_v41  ;;  %v78_v0 = vmul.f32 %v56_v42, %v56_v42 }
  0x11   :  { %v79_v1 = vmul.f32 %v57_v43, %v57_v43  ;;  %v80_v2 = vmul.f32 %v58_v44, %v58_v44  ;;  %v81_v3 = vmul.f32 %v59_v45, %v59_v45  ;;  %v82_v4 = vmul.f32 %v60_v46, %v60_v46 }
  0x12   :  { %v83_v5 = vmul.f32 %v61_v47, %v61_v47  ;;  %v84_v6 = vmul.f32 %v62_v48, %v62_v48  ;;  %v85_v7 = vmul.f32 %v63_v49, %v63_v49  ;;  %v86_v8 = vmul.f32 %v64_v50, %v64_v50 }
  0x13   :  { %v87_v9 = vadd.f32 %v76_v62, %v65_v51  ;;  %v88_v10 = vadd.f32 %v77_v63, %v66_v52  ;;  %v89_v11 = vadd.f32 %v78_v0, %v67_v53  ;;  %v90_v12 = vadd.f32 %v79_v1, %v68_v54 }
  0x14   :  { %v91_v13 = vadd.f32 %v80_v2, %v69_v55  ;;  %v92_v14 = vadd.f32 %v81_v3, %v70_v56  ;;  %v93_v15 = vadd.f32 %v82_v4, %v71_v57  ;;  %v94_v16 = vadd.f32 %v83_v5, %v72_v58 }
  0x15   :  { %v95_v17 = vadd.f32 %v84_v6, %v73_v59  ;;  %v96_v18 = vadd.f32 %v85_v7, %v74_v60  ;;  %v97_v19 = vadd.f32 %v86_v8, %v75_v61 }
  0x16   :  { %v98_v20 = vmin.f32 %v87_v9, %v91_v13  ;;  %v99_v21 = vmin.f32 %v88_v10, %v92_v14  ;;  %v100_v22 = vmin.f32 %v89_v11, %v93_v15  ;;  %v101_v23 = vmin.f32 %v90_v12, %v94_v16 }
  0x18   :  { %v102_v24 = vmin.f32 %v98_v20, %v95_v17  ;;  %v103_v25 = vmin.f32 %v99_v21, %v96_v18  ;;  %v104_v26 = vmin.f32 %v100_v22, %v97_v19 }
  0x1a   :  { %v105_v27 = vmin.f32 %v102_v24, %v103_v25  ;;  %v106_v28 = vmin.f32 %v104_v26, %v101_v23 }
  0x1c   :  { %v107_v29 = vmin.f32 %v105_v27, %v106_v28 }
  0x1e   :  { %v108_v30 = vrot.slane %v107_v29, 4 }
  0x20   :  { %v109_v31 = vmin.f32 %v107_v29, %v108_v30 }
  0x22   :  { %v110_v32 = vrot.slane %v109_v31, 2 }
  0x24   :  { %v111_v33 = vmin.f32 %v109_v31, %v110_v32 }
  0x26   :  { %v112_v34 = vrot.slane %v111_v33, 1 }
  0x28   :  { %v113_v35 = vmin.f32 %v111_v33, %v112_v34 }
  0x2a   :  { %137 = vrsqrt.f32 %v113_v35  ;;  %vm116_vm0 = vcmp.eq.f32.partialorder %v113_v35, inf  ;;  %v119_v37 = vand.u32 2147483648, %v113_v35  ;;  %vm118_vm1 = vcmp.eq.f32.partialorder %v113_v35, 0.0 }
  0x34   :  { %v138_v36 = vpop.eup %137 }
  0x35   :  { %v115_v38 = vmul.f32 %v138_v36, %v113_v35 }
  0x37   :  { %v117_v39 = vsel %vm116_vm0, %v113_v35, %v115_v38 }
  0x38   :  { %v120_v40 = vsel %vm118_vm1, %v119_v37, %v117_v39 }
  0x39   :  { %121 = vst [vmem:[%s228_s2] sm:$0x1] %v120_v40 }

</bundles_post_ra>
